<compile_context>
chip_gen: v5e
topology: v5e:2x2
jax: 0.10.0
libtpu: 0.0.40
codegen_flags: <defaults>
</compile_context>

<pallas_src>
import functools

import jax
import jax.numpy as jnp
from jax import lax
from jax.experimental import pallas as pl
from jax.experimental.pallas import tpu as pltpu

LN_EPS = 1e-6
_LANE = 128
_SUBLANE = 8


def _round_up(x, m):
    return ((x + m - 1) // m) * m


def _cdiv(a, b):
    return (a + b - 1) // b


@functools.lru_cache(maxsize=1)
def _vmem_capacity_bytes():
    # 128 MiB on v5e/v6e, 64 MiB per TensorCore on v7x.
    try:
        return int(pltpu.get_tpu_info().vmem_capacity_bytes)
    except Exception:
        return 64 << 20  # conservative fallback (v7x per-TC)


def _const_block_spec(shape):
    """BlockSpec for a grid-invariant block: fetched once, single-buffered."""
    index_map = lambda i: (0, 0)
    try:
        return pl.BlockSpec(shape, index_map, pipeline_mode=pl.Buffered(1))
    except (TypeError, AttributeError):  # older jax without pipeline_mode
        return pl.BlockSpec(shape, index_map)


def mlp_res_block_kernel(x_ref, gamma_ref, beta_ref, w1_ref, b1_ref,
                         w2_ref, b2_ref, o_ref, *, in_dim):
    x = x_ref[...]                                     # [tm, in_pad]
    xf = x.astype(jnp.float32)
    in_pad = xf.shape[-1]

    gamma = gamma_ref[...]                             # [1, in_pad]  f32
    beta = beta_ref[...]                               # [1, in_pad]  f32
    b1 = b1_ref[...]                                   # [1, hid_pad] f32
    b2 = b2_ref[...]                                   # [1, in_pad]  f32

    # ---- LayerNorm(in_dim, eps=1e-6), biased variance over the TRUE width ---
    inv_n = jnp.float32(1.0 / in_dim)
    if in_pad == in_dim:
        mean = jnp.sum(xf, axis=-1, keepdims=True) * inv_n
        centered = xf - mean
    else:
        lane = lax.broadcasted_iota(jnp.int32, xf.shape, 1)
        valid = lane < in_dim                          # lanes >= in_dim are pad
        mean = jnp.sum(jnp.where(valid, xf, 0.0), axis=-1, keepdims=True) * inv_n
        centered = jnp.where(valid, xf - mean, 0.0)
    var = jnp.sum(centered * centered, axis=-1, keepdims=True) * inv_n
    xn = centered * lax.rsqrt(var + LN_EPS) * gamma + beta   # pad lanes stay 0

    # ---- fc1 -> ReLU (MXU, f32 accumulation) --------------------------------
    w1 = w1_ref[...]                                   # [in_pad, hid_pad]
    h = jnp.dot(xn.astype(w1.dtype), w1, preferred_element_type=jnp.float32)
    h = jnp.maximum(h + b1, 0.0)                       # [tm, hid_pad] f32

    # ---- fc2 -----------------------------------------------------------------
    w2 = w2_ref[...]                                   # [hid_pad, in_pad]
    y = jnp.dot(h.astype(w2.dtype), w2, preferred_element_type=jnp.float32) + b2

    # ---- residual add: re-read x from the resident VMEM tile ----------------
    o_ref[...] = (x_ref[...].astype(jnp.float32) + y).astype(o_ref.dtype)


@functools.partial(jax.jit, static_argnames=("tm", "matmul_dtype"))
def mlp_res_block(x, gamma, beta, w1, b1, w2, b2, *,
                  tm=None, matmul_dtype=jnp.bfloat16):
    """x: [..., in_dim]. W1: [in_dim, hid_dim], W2: [hid_dim, in_dim].
    Returns the same shape/dtype as x."""
    orig_shape = x.shape
    in_dim = orig_shape[-1]
    hid_dim = w1.shape[1]

    in_pad = _round_up(in_dim, _LANE)
    hid_pad = _round_up(hid_dim, _LANE)

    x2 = x.reshape(-1, in_dim)
    n = x2.shape[0]

    def pad_last(a, target):
        d = target - a.shape[-1]
        if d == 0:
            return a
        return jnp.pad(a, [(0, 0)] * (a.ndim - 1) + [(0, d)])

    # Lane-dense feature dims (no-op if already multiples of 128).
    x2 = pad_last(x2, in_pad)

    w1p = w1.astype(matmul_dtype)
    w2p = w2.astype(matmul_dtype)
    if (in_pad, hid_pad) != (in_dim, hid_dim):
        w1p = jnp.pad(w1p, ((0, in_pad - in_dim), (0, hid_pad - hid_dim)))
        w2p = jnp.pad(w2p, ((0, hid_pad - hid_dim), (0, in_pad - in_dim)))

    gamma2 = pad_last(gamma.reshape(1, in_dim).astype(jnp.float32), in_pad)
    beta2 = pad_last(beta.reshape(1, in_dim).astype(jnp.float32), in_pad)
    b1_2 = pad_last(b1.reshape(1, hid_dim).astype(jnp.float32), hid_pad)
    b2_2 = pad_last(b2.reshape(1, in_dim).astype(jnp.float32), in_pad)

    # ---- row tile: generation-aware cap, >= 2 grid steps when n permits ----
    vmem_cap = _vmem_capacity_bytes()
    if tm is None:
        tm = 1024 if vmem_cap >= (100 << 20) else 512
    half = _round_up(max(_cdiv(n, 2), 1), _SUBLANE)
    tm_eff = max(_SUBLANE, min(_round_up(tm, _SUBLANE), half))
    grid = (_cdiv(n, tm_eff),)   # trailing partial block handled by Pallas

    # ---- VMEM budget (weights single-buffered, x/out double-buffered) -------
    xb = x2.dtype.itemsize
    ob = x.dtype.itemsize
    wb = jnp.dtype(matmul_dtype).itemsize
    est = (
        2 * tm_eff * in_pad * xb            # x tile (double-buffered)
        + 2 * tm_eff * in_pad * ob          # out tile (double-buffered)
        + in_pad * hid_pad * wb             # W1 (single-buffered, constant)
        + hid_pad * in_pad * wb             # W2 (single-buffered, constant)
        + (3 * in_pad + hid_pad) * 4        # gamma/beta/b1/b2
        + tm_eff * hid_pad * 4              # hidden activation (f32)
        + 4 * tm_eff * in_pad * 4           # LN / residual temporaries (f32)
    )
    vmem_limit = int(min(max(2 * est, 32 << 20), (vmem_cap * 3) // 4))

    kernel = functools.partial(mlp_res_block_kernel, in_dim=in_dim)

    out = pl.pallas_call(
        kernel,
        out_shape=jax.ShapeDtypeStruct((n, in_pad), x.dtype),
        grid_spec=pltpu.PrefetchScalarGridSpec(
            num_scalar_prefetch=0,
            grid=grid,
            in_specs=[
                pl.BlockSpec((tm_eff, in_pad), lambda i: (i, 0)),   # x tile
                _const_block_spec((1, in_pad)),                     # gamma
                _const_block_spec((1, in_pad)),                     # beta
                _const_block_spec((in_pad, hid_pad)),               # W1
                _const_block_spec((1, hid_pad)),                    # b1
                _const_block_spec((hid_pad, in_pad)),               # W2
                _const_block_spec((1, in_pad)),                     # b2
            ],
            out_specs=pl.BlockSpec((tm_eff, in_pad), lambda i: (i, 0)),
        ),
        compiler_params=pltpu.CompilerParams(
            dimension_semantics=("parallel",),
            vmem_limit_bytes=vmem_limit,
        ),
    )(x2, gamma2, beta2, w1p, b1_2, w2p, b2_2)

    if in_pad != in_dim:
        out = out[:, :in_dim]
    return out.reshape(orig_shape)


def reference(x, gamma, beta, w1, b1, w2, b2):
    xf = x.astype(jnp.float32)
    mean = jnp.mean(xf, axis=-1, keepdims=True)
    var = jnp.mean((xf - mean) ** 2, axis=-1, keepdims=True)
    xn = (xf - mean) / jnp.sqrt(var + LN_EPS) * gamma + beta
    h = jnp.maximum(xn @ w1 + b1, 0.0)
    y = h @ w2 + b2
    return (xf + y).astype(x.dtype)


if __name__ == "__main__":
    # Small shapes consistent with the module: batch=2, seq=8, in_dim=32, hid_dim=64.
    batch, seq, in_dim, hid_dim = 2, 8, 32, 64

    key = jax.random.PRNGKey(0)
    kx, kg, kb, kw1, kb1, kw2, kb2 = jax.random.split(key, 7)

    x = jax.random.normal(kx, (batch, seq, in_dim), dtype=jnp.float32)

    # Deterministic synthetic parameters (not a checkpoint load).
    gamma = jnp.ones((in_dim,), jnp.float32) + 0.01 * jax.random.normal(kg, (in_dim,))
    beta = 0.01 * jax.random.normal(kb, (in_dim,))
    w1 = 0.1 * jax.random.normal(kw1, (in_dim, hid_dim), dtype=jnp.float32)
    b1 = 0.1 * jax.random.normal(kb1, (hid_dim,), dtype=jnp.float32)
    w2 = 0.1 * jax.random.normal(kw2, (hid_dim, in_dim), dtype=jnp.float32)
    b2 = 0.1 * jax.random.normal(kb2, (in_dim,), dtype=jnp.float32)

    out = jax.block_until_ready(mlp_res_block(x, gamma, beta, w1, b1, w2, b2))
    ref = reference(x, gamma, beta, w1, b1, w2, b2)
    assert out.shape == x.shape and out.dtype == x.dtype
    # bf16 MXU operands with f32 accumulation -> ~1e-2 relative tolerance.
    assert jnp.allclose(out, ref, atol=2e-2, rtol=2e-2), "bf16 path mismatch vs reference"

    # Exact-parity path: f32 matmuls, tight tolerance.
    out_f32 = jax.block_until_ready(
        mlp_res_block(x, gamma, beta, w1, b1, w2, b2, matmul_dtype=jnp.float32))
    assert jnp.allclose(out_f32, ref, atol=1e-4, rtol=1e-4), "f32 path mismatch"

    print("KERNEL_OK")
</pallas_src>

<mosaic_0001>
module attributes {stable_mosaic.version = 11 : i64} {
  func.func @mlp_res_block_kernel(%arg0: i32, %arg1: memref<8x128xf32, #tpu.memory_space<vmem>>, %arg2: memref<1x128xf32, #tpu.memory_space<vmem>>, %arg3: memref<1x128xf32, #tpu.memory_space<vmem>>, %arg4: memref<128x128xbf16, #tpu.memory_space<vmem>>, %arg5: memref<1x128xf32, #tpu.memory_space<vmem>>, %arg6: memref<128x128xbf16, #tpu.memory_space<vmem>>, %arg7: memref<1x128xf32, #tpu.memory_space<vmem>>, %arg8: memref<8x128xf32, #tpu.memory_space<vmem>>) attributes {dimension_semantics = [#tpu.dimension_semantics<parallel>], iteration_bounds = array<i64: 2>, scalar_prefetch = 0 : i64, scratch_operands = 0 : i64, tpu.core_type = #tpu.core_type<tc>, window_params = [{transform_indices = @transform_0, window_bounds = array<i64: 8, 128>}, {pipeline_mode = #tpu.pipeline_mode<synchronous>, transform_indices = @transform_1, window_bounds = array<i64: 1, 128>}, {pipeline_mode = #tpu.pipeline_mode<synchronous>, transform_indices = @transform_2, window_bounds = array<i64: 1, 128>}, {pipeline_mode = #tpu.pipeline_mode<synchronous>, transform_indices = @transform_3, window_bounds = array<i64: 128, 128>}, {pipeline_mode = #tpu.pipeline_mode<synchronous>, transform_indices = @transform_4, window_bounds = array<i64: 1, 128>}, {pipeline_mode = #tpu.pipeline_mode<synchronous>, transform_indices = @transform_5, window_bounds = array<i64: 128, 128>}, {pipeline_mode = #tpu.pipeline_mode<synchronous>, transform_indices = @transform_6, window_bounds = array<i64: 1, 128>}, {transform_indices = @transform_7, window_bounds = array<i64: 8, 128>}]} {
    %c0 = arith.constant 0 : index
    %c0_0 = arith.constant 0 : index
    %0 = vector.load %arg1[%c0, %c0_0] : memref<8x128xf32, #tpu.memory_space<vmem>>, vector<8x128xf32>
    %c0_1 = arith.constant 0 : index
    %c0_2 = arith.constant 0 : index
    %1 = vector.load %arg2[%c0_1, %c0_2] : memref<1x128xf32, #tpu.memory_space<vmem>>, vector<1x128xf32>
    %c0_3 = arith.constant 0 : index
    %c0_4 = arith.constant 0 : index
    %2 = vector.load %arg3[%c0_3, %c0_4] : memref<1x128xf32, #tpu.memory_space<vmem>>, vector<1x128xf32>
    %c0_5 = arith.constant 0 : index
    %c0_6 = arith.constant 0 : index
    %3 = vector.load %arg5[%c0_5, %c0_6] : memref<1x128xf32, #tpu.memory_space<vmem>>, vector<1x128xf32>
    %c0_7 = arith.constant 0 : index
    %c0_8 = arith.constant 0 : index
    %4 = vector.load %arg7[%c0_7, %c0_8] : memref<1x128xf32, #tpu.memory_space<vmem>>, vector<1x128xf32>
    %5 = tpu.iota {dimensions = array<i32: 1>} : vector<8x128xi32>
    %c32_i32 = arith.constant 32 : i32
    %6 = vector.broadcast %c32_i32 : i32 to vector<8x128xi32>
    %7 = arith.cmpi slt, %5, %6 : vector<8x128xi32>
    %cst = arith.constant 0.000000e+00 : f32
    %8 = vector.broadcast %cst : f32 to vector<8x128xf32>
    %9 = arith.select %7, %0, %8 : vector<8x128xi1>, vector<8x128xf32>
    %cst_9 = arith.constant dense<0.000000e+00> : vector<8xf32>
    %10 = vector.multi_reduction <add>, %9, %cst_9 [1] : vector<8x128xf32> to vector<8xf32>
    %11 = vector.shape_cast %10 : vector<8xf32> to vector<8x1xf32>
    %cst_10 = arith.constant 3.125000e-02 : f32
    %12 = vector.broadcast %cst_10 : f32 to vector<8x1xf32>
    %13 = arith.mulf %11, %12 : vector<8x1xf32>
    %14 = vector.broadcast %13 : vector<8x1xf32> to vector<8x128xf32>
    %15 = arith.subf %0, %14 : vector<8x128xf32>
    %cst_11 = arith.constant 0.000000e+00 : f32
    %16 = vector.broadcast %cst_11 : f32 to vector<8x128xf32>
    %17 = arith.select %7, %15, %16 : vector<8x128xi1>, vector<8x128xf32>
    %18 = arith.mulf %17, %17 : vector<8x128xf32>
    %cst_12 = arith.constant dense<0.000000e+00> : vector<8xf32>
    %19 = vector.multi_reduction <add>, %18, %cst_12 [1] : vector<8x128xf32> to vector<8xf32>
    %20 = vector.shape_cast %19 : vector<8xf32> to vector<8x1xf32>
    %cst_13 = arith.constant 3.125000e-02 : f32
    %21 = vector.broadcast %cst_13 : f32 to vector<8x1xf32>
    %22 = arith.mulf %20, %21 : vector<8x1xf32>
    %cst_14 = arith.constant 9.99999997E-7 : f32
    %23 = vector.broadcast %cst_14 : f32 to vector<8x1xf32>
    %24 = arith.addf %22, %23 : vector<8x1xf32>
    %25 = math.rsqrt %24 : vector<8x1xf32>
    %26 = vector.broadcast %25 : vector<8x1xf32> to vector<8x128xf32>
    %27 = arith.mulf %17, %26 : vector<8x128xf32>
    %28 = vector.broadcast %1 : vector<1x128xf32> to vector<8x128xf32>
    %29 = arith.mulf %27, %28 : vector<8x128xf32>
    %30 = vector.broadcast %2 : vector<1x128xf32> to vector<8x128xf32>
    %31 = arith.addf %29, %30 : vector<8x128xf32>
    %c0_15 = arith.constant 0 : index
    %c0_16 = arith.constant 0 : index
    %32 = vector.load %arg4[%c0_15, %c0_16] : memref<128x128xbf16, #tpu.memory_space<vmem>>, vector<128x128xbf16>
    %33 = arith.truncf %31 : vector<8x128xf32> to vector<8x128xbf16>
    %cst_17 = arith.constant dense<0.000000e+00> : vector<8x128xf32>
    %34 = tpu.matmul %33, %32, %cst_17 {dimension_numbers = #tpu.dot_dimension_numbers<[1], [0], [0], [1], [0, 0, 1, 1], [], []>} : vector<8x128xbf16>, vector<128x128xbf16>, vector<8x128xf32> -> vector<8x128xf32>
    %35 = vector.broadcast %3 : vector<1x128xf32> to vector<8x128xf32>
    %36 = arith.addf %34, %35 : vector<8x128xf32>
    %cst_18 = arith.constant 0.000000e+00 : f32
    %37 = vector.broadcast %cst_18 : f32 to vector<8x128xf32>
    %38 = arith.maximumf %36, %37 : vector<8x128xf32>
    %c0_19 = arith.constant 0 : index
    %c0_20 = arith.constant 0 : index
    %39 = vector.load %arg6[%c0_19, %c0_20] : memref<128x128xbf16, #tpu.memory_space<vmem>>, vector<128x128xbf16>
    %40 = arith.truncf %38 : vector<8x128xf32> to vector<8x128xbf16>
    %cst_21 = arith.constant dense<0.000000e+00> : vector<8x128xf32>
    %41 = tpu.matmul %40, %39, %cst_21 {dimension_numbers = #tpu.dot_dimension_numbers<[1], [0], [0], [1], [0, 0, 1, 1], [], []>} : vector<8x128xbf16>, vector<128x128xbf16>, vector<8x128xf32> -> vector<8x128xf32>
    %42 = vector.broadcast %4 : vector<1x128xf32> to vector<8x128xf32>
    %43 = arith.addf %41, %42 : vector<8x128xf32>
    %c0_22 = arith.constant 0 : index
    %c0_23 = arith.constant 0 : index
    %44 = vector.load %arg1[%c0_22, %c0_23] : memref<8x128xf32, #tpu.memory_space<vmem>>, vector<8x128xf32>
    %45 = arith.addf %44, %43 : vector<8x128xf32>
    %c0_24 = arith.constant 0 : index
    %c0_25 = arith.constant 0 : index
    %46 = vector.load %arg8[%c0_24, %c0_25] : memref<8x128xf32, #tpu.memory_space<vmem>>, vector<8x128xf32>
    tpu.vector_store %arg8[%c0_24, %c0_25], %45 {strides = array<i32>} : memref<8x128xf32, #tpu.memory_space<vmem>>, vector<8x128xf32>,
    return
  }
  func.func @transform_0(%arg0: i32) -> (i32, i32) {
    %c0_i32 = arith.constant 0 : i32
    %c0_i32_0 = arith.constant 0 : i32
    return %arg0, %c0_i32 : i32, i32
  }
  func.func @transform_1(%arg0: i32) -> (i32, i32) {
    %c0_i32 = arith.constant 0 : i32
    %c0_i32_0 = arith.constant 0 : i32
    %c0_i32_1 = arith.constant 0 : i32
    return %c0_i32, %c0_i32_0 : i32, i32
  }
  func.func @transform_2(%arg0: i32) -> (i32, i32) {
    %c0_i32 = arith.constant 0 : i32
    %c0_i32_0 = arith.constant 0 : i32
    %c0_i32_1 = arith.constant 0 : i32
    return %c0_i32, %c0_i32_0 : i32, i32
  }
  func.func @transform_3(%arg0: i32) -> (i32, i32) {
    %c0_i32 = arith.constant 0 : i32
    %c0_i32_0 = arith.constant 0 : i32
    %c0_i32_1 = arith.constant 0 : i32
    return %c0_i32, %c0_i32_0 : i32, i32
  }
  func.func @transform_4(%arg0: i32) -> (i32, i32) {
    %c0_i32 = arith.constant 0 : i32
    %c0_i32_0 = arith.constant 0 : i32
    %c0_i32_1 = arith.constant 0 : i32
    return %c0_i32, %c0_i32_0 : i32, i32
  }
  func.func @transform_5(%arg0: i32) -> (i32, i32) {
    %c0_i32 = arith.constant 0 : i32
    %c0_i32_0 = arith.constant 0 : i32
    %c0_i32_1 = arith.constant 0 : i32
    return %c0_i32, %c0_i32_0 : i32, i32
  }
  func.func @transform_6(%arg0: i32) -> (i32, i32) {
    %c0_i32 = arith.constant 0 : i32
    %c0_i32_0 = arith.constant 0 : i32
    %c0_i32_1 = arith.constant 0 : i32
    return %c0_i32, %c0_i32_0 : i32, i32
  }
  func.func @transform_7(%arg0: i32) -> (i32, i32) {
    %c0_i32 = arith.constant 0 : i32
    %c0_i32_0 = arith.constant 0 : i32
    return %arg0, %c0_i32 : i32, i32
  }
}

</mosaic_0001>

<bundles_post_ra>
// kernel: mlp_res_block.1
= control target key start
LH: loop header
LB: loop body
LE: loop exit
PB: predicated region body
PF: predicated region fallthrough
CT: control target
= control target key end

     0   :  { %s681_s24 = smov 0   ;;  %s770_s0 = inlined_call_operand.vmem [shape: f32[16,128], index: 0, kind: input, shape index: {}]   ;;  %s771_s1 = inlined_call_operand.vmem [shape: f32[1,128], index: 1, kind: input, shape index: {}]   ;;  %s772_s2 = inlined_call_operand.vmem [shape: f32[1,128], index: 2, kind: input, shape index: {}]   ;;  %s773_s3 = inlined_call_operand.vmem [shape: bf16[128,128], index: 3, kind: input, shape index: {}]   ;;  %s774_s4 = inlined_call_operand.vmem [shape: f32[1,128], index: 4, kind: input, shape index: {}]   ;;  %s775_s5 = inlined_call_operand.vmem [shape: bf16[128,128], index: 5, kind: input, shape index: {}]   ;;  %s776_s6 = inlined_call_operand.vmem [shape: f32[1,128], index: 6, kind: input, shape index: {}]   ;;  %s777_s7 = inlined_call_operand.vmem [shape: f32[16,128], index: 7, kind: output, shape index: {}]  }
   0x1 LB: > { %s530_s25 = sadd.s32 4294967295, %s639_s24   ;;  %p534_p0 = scmp.ge.s32.totalorder %s639_s24, 1  ;;  %s639_s24 = sphi %s681_s24, %s17_s24  }
   0x2   : > { %p236_p1 = scmp.lt.s32.totalorder %s639_s24, 3 }
   0x4   : > { %p237_p2 = pnand %p534_p0, %p236_p1 }
   0x5   : > { %p266_p3 = scmp.lt.s32.totalorder (!%p237_p2), %s530_s25, 1 }
   0x6   : > { %240 = sbr.rel (%p237_p2) target bundleno = 552 (0x228), region = 48 }
   0xb   : > { %v279_v0 = vlaneseq  ;;  %s779_s25 = smov (!%p266_p3, %s530_s25), 1  ;;  %v610_v4 = vld [vmem:[%s773_s3 + $0x38] sm:$0xff]  ;;  %v609_v10 = vld [vmem:[%s773_s3 + $0x30] sm:$0xff]  ;;  %v608_v11 = vld [vmem:[%s773_s3 + $0x28] sm:$0xff] }
   0xc   : > { %s535_s26 = sshll.u32 %s779_s25, 3  ;;  %380 = vmatpush.bf16.msra.mxu0 %v610_v4  ;;  %v607_v12 = vld [vmem:[%s773_s3 + $0x20] sm:$0xff]  ;;  %v606_v13 = vld [vmem:[%s773_s3 + $0x18] sm:$0xff]  ;;  %v605_v14 = vld [vmem:[%s773_s3 + $0x10] sm:$0xff] }
   0xd   : > { %v280_v1 = vand.u32 127, %v279_v0  ;;  %s269_s29 = scalar_lea.vmem %s770_s0, %s535_s26  ;;  %v604_v15 = vld [vmem:[%s773_s3 + $0x8] sm:$0xff]  ;;  %v603_v16 = vld [vmem:[%s773_s3] sm:$0xff]  ;;  %v618_v17 = vld [vmem:[%s775_s5 + $0x38] sm:$0xff]  ;;  %s273_s9 = scalar_lea.vmem %s777_s7, %s535_s26 }
   0xe   : > { %v697_v2 = vld [vmem:[%s269_s29] sm:$0xff]  ;;  %462 = vmatpush.bf16.msra.mxu1 %v618_v17  ;;  %v617_v20 = vld [vmem:[%s775_s5 + $0x30] sm:$0xff]  ;;  %v616_v22 = vld [vmem:[%s775_s5 + $0x28] sm:$0xff] }
   0xf   : > { %vm281_vm0 = vcmp.lt.s32.totalorder %v280_v1, 32  ;;  %v615_v23 = vld [vmem:[%s775_s5 + $0x20] sm:$0xff]  ;;  %v614_v26 = vld [vmem:[%s775_s5 + $0x18] sm:$0xff]  ;;  %v613_v29 = vld [vmem:[%s775_s5 + $0x10] sm:$0xff] }
  0x10   : > { %v282_v3 = vsel %vm281_vm0, %v697_v2, 0.0  ;;  %381 = vmatpush.bf16.msra.mxu0 %v609_v10  ;;  %v627_v32 = vld [vmem:[%s771_s1] ss:$0 sm:$0xff]  ;;  %v612_v39 = vld [vmem:[%s775_s5 + $0x8] sm:$0xff] }
  0x11   : > { %283 = vadd.xlane.f32.xlu0 %v282_v3  ;;  %v628_v35 = vld [vmem:[%s772_s2] ss:$0 sm:$0xff] }
  0x12   : > { %463 = vmatpush.bf16.msra.mxu1 %v617_v20  ;;  %v611_v40 = vld [vmem:[%s775_s5] sm:$0xff] }
  0x13   : > { %v629_v41 = vld [vmem:[%s774_s4] ss:$0 sm:$0xff] }
  0x14   : > { %382 = vmatpush.bf16.msra.mxu0 %v608_v11  ;;  %v630_v47 = vld [vmem:[%s776_s6] ss:$0 sm:$0xff] }
  0x16   : > { %464 = vmatpush.bf16.msra.mxu1 %v616_v22 }
  0x18   : > { %383 = vmatpush.bf16.msra.mxu0 %v607_v12 }
  0x1a   : > { %465 = vmatpush.bf16.msra.mxu1 %v615_v23 }
  0x1c   : > { %384 = vmatpush.bf16.msra.mxu0 %v606_v13 }
  0x1e   : > { %466 = vmatpush.bf16.msra.mxu1 %v614_v26 }
  0x20   : > { %385 = vmatpush.bf16.msra.mxu0 %v605_v14 }
  0x22   : > { %467 = vmatpush.bf16.msra.mxu1 %v613_v29 }
  0x24   : > { %386 = vmatpush.bf16.msra.mxu0 %v604_v15 }
  0x26   : > { %468 = vmatpush.bf16.msra.mxu1 %v612_v39 }
  0x28   : > { %387 = vmatpush.bf16.msra.mxu0 %v603_v16 }
  0x2a   : > { %469 = vmatpush.bf16.msra.mxu1 %v611_v40 }
  0x84   : > { %v284_v5 = vpop.xlane.xlu0 %283 }
  0x85   : > { %v285_v6 = vmul.f32 0.03125, %v284_v5 }
  0x87   : > { %v286_v7 = vsub.f32 %v697_v2, %v285_v6 }
  0x89   : > { %v287_v8 = vsel %vm281_vm0, %v286_v7, 0.0 }
  0x8a   : > { %v288_v9 = vmul.f32 %v287_v8, %v287_v8 }
  0x8c   : > { %289 = vadd.xlane.f32.xlu0 %v288_v9 }
  0xff   : > { %v290_v18 = vpop.xlane.xlu0 %289 }
 0x100   : > { %v291_v19 = vmul.f32 0.03125, %v290_v18 }
 0x102   : > { %v292_v21 = vadd.f32 1e-06, %v291_v19 }
 0x104   : > { %631 = vrsqrt.f32 %v292_v21  ;;  %vm299_vm2 = vweird.f32 %v292_v21 }
 0x10a   : > { %v632_v24 = vpop.eup %631 }
 0x10b   : > { %v294_v25 = vmul.f32 %v632_v24, %v292_v21  ;;  %vm300_vm1 = vweird.f32 %v632_v24 }
 0x10c   : > { %vm301_vm3 = vmor %vm299_vm2, %vm300_vm1 }
 0x10d   : > { %v295_v27 = vmul.f32 %v632_v24, %v294_v25 }
 0x10f   : > { %v296_v28 = vmul.f32 0.5, %v295_v27 }
 0x111   : > { %v297_v30 = vsub.f32 1.5, %v296_v28 }
 0x113   : > { %v298_v31 = vmul.f32 %v632_v24, %v297_v30 }
 0x115   : > { %v302_v33 = vsel %vm301_vm3, %v632_v24, %v298_v31 }
 0x116   : > { %v303_v34 = vmul.f32 %v302_v33, %v287_v8 }
 0x118   : > { %v307_v36 = vmul.f32 %v627_v32, %v303_v34 }
 0x11a   : > { %v311_v37 = vadd.f32 %v628_v35, %v307_v36 }
 0x11c   : > { %v328_v38 = vpack.c.bf16 %v311_v37, %v311_v37 }
 0x11e   : > { %388 = vmatmul.bf16.vlgmr.msra.gmra.mxu0 %v328_v38 }
 0x19b   : > { %v389_v42 = vpop.f32.mrf.mxu0 }
 0x19c   : > { %v390_v43 = vadd.f32 %v629_v41, %v389_v42 }
 0x19e   : > { %v393_v44 = vmax.f32 %v390_v43, 0.0 }
 0x1a0   : > { %v410_v45 = vpack.c.bf16 %v393_v44, %v393_v44 }
 0x1a2   : > { %470 = vmatmul.bf16.vlgmr.msra.gmra.mxu1 %v410_v45 }
 0x1a3   : > { %v391_v46 = vpop.f32.mrf.mxu0 }
 0x21f   : > { %v471_v48 = vpop.f32.mrf.mxu1 }
 0x220   : > { %v472_v49 = vadd.f32 %v630_v47, %v471_v48 }
 0x222   : > { %v475_v50 = vadd.f32 %v472_v49, %v697_v2 }
 0x224   : > { %476 = vst [vmem:[%s273_s9] sm:$0xff] %v475_v50 }
 0x227   : > { %v473_v51 = vpop.f32.mrf.mxu1 }
 0x228 PF: > { %s17_s24 = sadd.s32 1, %s639_s24  }
 0x229   : > { %p14_p4 = scmp.ge.s32.totalorder %s17_s24, 4  }
 0x22b   :  { %16 = sbr.rel (!%p14_p4) target bundleno = 1 (0x1), region = 78 }

</bundles_post_ra>
